<compile_context>
chip_gen: v5e
topology: v5e:2x2
jax: 0.10.0
libtpu: 0.0.40
codegen_flags: <defaults>
</compile_context>

<pallas_src>
import functools

import jax
import jax.numpy as jnp
from jax.experimental import pallas as pl
from jax.experimental.pallas import tpu as pltpu

_LANE = 128


def _round_up(a, b):
    return (a + b - 1) // b * b


def _pick_hw_tile(c, hw, dtype_bytes, max_lanes=2048,
                  vmem_budget_bytes=8 * 1024 * 1024):
    """Lane-tile size (multiple of 128) and padded HW so every tile is full."""
    hw_pad = _round_up(hw, _LANE)
    # 2 slabs (in + out) x 2 (double buffering) x C x T x dtype_bytes <= budget
    max_t = max(_LANE,
                (vmem_budget_bytes // (4 * c * dtype_bytes)) // _LANE * _LANE)
    t = min(hw_pad, max_t, max_lanes)
    hw_pad = _round_up(hw_pad, t)
    return t, hw_pad


def _pad_spatial(x, hw_pad):
    n, c, h, w = x.shape
    hw = h * w
    x3 = x.reshape(n, c, hw)
    if hw_pad != hw:
        x3 = jnp.pad(x3, ((0, 0), (0, 0), (0, hw_pad - hw)))
    return x3


def _affine_kernel(scale_ref, shift_ref, x_ref, o_ref):
    # scale_ref / shift_ref: (C, 1) f32 -> broadcast over lanes (VPU only).
    # x_ref / o_ref: (C, T_HW) lane-dense slab of one batch element.
    x = x_ref[...].astype(jnp.float32)
    o_ref[...] = (x * scale_ref[...] + shift_ref[...]).astype(o_ref.dtype)


def _stats_kernel(x_ref, sum_ref, sumsq_ref):
    # Accumulate per-channel sum and sum-of-squares across the whole grid.
    @pl.when(jnp.logical_and(pl.program_id(0) == 0, pl.program_id(1) == 0))
    def _():
        sum_ref[...] = jnp.zeros_like(sum_ref)
        sumsq_ref[...] = jnp.zeros_like(sumsq_ref)

    x = x_ref[...].astype(jnp.float32)
    sum_ref[...] += jnp.sum(x, axis=1, keepdims=True)
    sumsq_ref[...] += jnp.sum(x * x, axis=1, keepdims=True)


@functools.partial(jax.jit, static_argnames=("eps",))
def actnorm_init_params(x, eps=1e-5):
    """Data-dependent init. Returns (log_scale, shift), each shape (C,)."""
    n, c, h, w = x.shape
    hw = h * w
    t_hw, hw_pad = _pick_hw_tile(c, hw, jnp.dtype(x.dtype).itemsize)
    x3 = _pad_spatial(x, hw_pad)

    s, sq = pl.pallas_call(
        _stats_kernel,
        out_shape=(jax.ShapeDtypeStruct((c, 1), jnp.float32),
                   jax.ShapeDtypeStruct((c, 1), jnp.float32)),
        grid_spec=pltpu.PrefetchScalarGridSpec(
            num_scalar_prefetch=0,
            grid=(n, hw_pad // t_hw),
            in_specs=[
                pl.BlockSpec((pl.Squeezed(), c, t_hw),
                             lambda b, t: (b, 0, t)),
            ],
            out_specs=(
                pl.BlockSpec((c, 1), lambda b, t: (0, 0)),
                pl.BlockSpec((c, 1), lambda b, t: (0, 0)),
            ),
        ),
        compiler_params=pltpu.CompilerParams(
            dimension_semantics=("arbitrary", "arbitrary")),
    )(x3)

    count = jnp.float32(n * hw)          # padding contributes 0 to both sums
    mean = s[:, 0] / count
    var = sq[:, 0] / count - mean * mean  # == mean((x - mean)^2)
    std = jnp.sqrt(var + eps)
    log_scale = jnp.log(1.0 / std)
    shift = -mean * jnp.exp(log_scale)
    return log_scale, shift


@jax.jit
def actnorm_forward(x, log_scale, shift):
    """y = x * exp(log_scale)[c] + shift[c];  logdet = sum(log_scale) * H * W."""
    n, c, h, w = x.shape
    hw = h * w
    t_hw, hw_pad = _pick_hw_tile(c, hw, jnp.dtype(x.dtype).itemsize)
    x3 = _pad_spatial(x, hw_pad)

    scale2d = jnp.exp(log_scale).astype(jnp.float32).reshape(c, 1)
    shift2d = shift.astype(jnp.float32).reshape(c, 1)

    y3 = pl.pallas_call(
        _affine_kernel,
        out_shape=jax.ShapeDtypeStruct((n, c, hw_pad), x.dtype),
        grid_spec=pltpu.PrefetchScalarGridSpec(
            num_scalar_prefetch=0,
            grid=(n, hw_pad // t_hw),
            in_specs=[
                pl.BlockSpec((c, 1), lambda b, t: (0, 0)),
                pl.BlockSpec((c, 1), lambda b, t: (0, 0)),
                pl.BlockSpec((pl.Squeezed(), c, t_hw),
                             lambda b, t: (b, 0, t)),
            ],
            out_specs=pl.BlockSpec((pl.Squeezed(), c, t_hw),
                                   lambda b, t: (b, 0, t)),
        ),
        compiler_params=pltpu.CompilerParams(
            # both axes independent -> shard across the 2 TCs on v7x
            dimension_semantics=("parallel", "parallel")),
    )(scale2d, shift2d, x3)

    y = y3[:, :, :hw].reshape(n, c, h, w)
    # scalar logdet (trivial; computed in plain JAX on (C,) params)
    logdet = jnp.sum(log_scale.astype(jnp.float32)) * (h * w)
    return y, logdet


class ActNorm2D:
    """Mirrors the PyTorch module: lazy data-dependent init on first forward."""

    def __init__(self, num_channels, eps=1e-5):
        self.eps = eps
        self.num_channels = num_channels
        self._log_scale = None
        self._shift = None
        self._init = False

    def forward(self, x):
        assert x.shape[1] == self.num_channels
        if not self._init:
            self._log_scale, self._shift = actnorm_init_params(x, eps=self.eps)
            self._init = True
        return actnorm_forward(x, self._log_scale, self._shift)

    __call__ = forward

    def inverse(self, x):
        # TODO(synk): inverse path kept in plain JAX (not part of forward()).
        scale = jnp.exp(-self._log_scale)[None, :, None, None]
        return (x - self._shift[None, :, None, None]) * scale


if __name__ == "__main__":
    key = jax.random.PRNGKey(0)
    N, C, H, W = 2, 4, 16, 16
    x = jax.random.normal(key, (N, C, H, W), dtype=jnp.float32)

    layer = ActNorm2D(C, eps=1e-5)
    y, logdet = layer(x)          # first call: data-dependent init + affine
    y = jax.block_until_ready(y)
    logdet = jax.block_until_ready(logdet)

    # Pure-JAX reference mirroring the PyTorch forward (including init).
    mean = jnp.mean(x, axis=(0, 2, 3))
    var = jnp.mean((x - mean[None, :, None, None]) ** 2, axis=(0, 2, 3))
    std = jnp.sqrt(var + 1e-5)
    ls = jnp.log(1.0 / std)
    sh = -mean * jnp.exp(ls)
    y_ref = x * jnp.exp(ls)[None, :, None, None] + sh[None, :, None, None]
    logdet_ref = jnp.sum(ls) * H * W

    assert y.shape == x.shape
    assert jnp.allclose(y, y_ref, rtol=1e-5, atol=1e-4), "y mismatch vs reference"
    assert jnp.allclose(logdet, logdet_ref, rtol=1e-4, atol=1e-3), "logdet mismatch"

    # Second call exercises the steady-state (already-initialized) path.
    y2, logdet2 = layer(x)
    jax.block_until_ready(y2)
    assert jnp.allclose(y2, y_ref, rtol=1e-5, atol=1e-4)

    print("KERNEL_OK")
</pallas_src>

<mosaic_0001>
module attributes {stable_mosaic.version = 11 : i64} {
  func.func @_stats_kernel(%arg0: i32, %arg1: i32, %arg2: memref<1x4x256xf32, #tpu.memory_space<vmem>>, %arg3: memref<4x1xf32, #tpu.memory_space<vmem>>, %arg4: memref<4x1xf32, #tpu.memory_space<vmem>>) attributes {dimension_semantics = [#tpu.dimension_semantics<arbitrary>, #tpu.dimension_semantics<arbitrary>], iteration_bounds = array<i64: 2, 1>, scalar_prefetch = 0 : i64, scratch_operands = 0 : i64, tpu.core_type = #tpu.core_type<tc>, window_params = [{transform_indices = @transform_0, window_bounds = array<i64: 1, 4, 256>}, {pipeline_mode = #tpu.pipeline_mode<synchronous>, transform_indices = @transform_1, window_bounds = array<i64: 4, 1>}, {pipeline_mode = #tpu.pipeline_mode<synchronous>, transform_indices = @transform_2, window_bounds = array<i64: 4, 1>}]} {
    %c0_i32 = arith.constant 0 : i32
    %0 = arith.cmpi eq, %arg0, %c0_i32 : i32
    %c0_i32_0 = arith.constant 0 : i32
    %1 = arith.cmpi eq, %arg1, %c0_i32_0 : i32
    %2 = arith.andi %0, %1 : i1
    %3 = arith.extui %2 : i1 to i32
    %c0_i32_1 = arith.constant 0 : i32
    %4 = arith.cmpi ne, %3, %c0_i32_1 : i32
    scf.if %4 {
      %cst_13 = arith.constant 0.000000e+00 : f32
      %18 = vector.broadcast %cst_13 : f32 to vector<4x1xf32>
      %c0_14 = arith.constant 0 : index
      %c0_15 = arith.constant 0 : index
      %19 = vector.load %arg3[%c0_14, %c0_15] : memref<4x1xf32, #tpu.memory_space<vmem>>, vector<4x1xf32>
      tpu.vector_store %arg3[%c0_14, %c0_15], %18 {strides = array<i32>} : memref<4x1xf32, #tpu.memory_space<vmem>>, vector<4x1xf32>,
      %cst_16 = arith.constant 0.000000e+00 : f32
      %20 = vector.broadcast %cst_16 : f32 to vector<4x1xf32>
      %c0_17 = arith.constant 0 : index
      %c0_18 = arith.constant 0 : index
      %21 = vector.load %arg4[%c0_17, %c0_18] : memref<4x1xf32, #tpu.memory_space<vmem>>, vector<4x1xf32>
      tpu.vector_store %arg4[%c0_17, %c0_18], %20 {strides = array<i32>} : memref<4x1xf32, #tpu.memory_space<vmem>>, vector<4x1xf32>,
    } else {
    }
    %c0 = arith.constant 0 : index
    %c0_2 = arith.constant 0 : index
    %c0_3 = arith.constant 0 : index
    %5 = vector.load %arg2[%c0, %c0_2, %c0_3] : memref<1x4x256xf32, #tpu.memory_space<vmem>>, vector<1x4x256xf32>
    %6 = vector.shape_cast %5 : vector<1x4x256xf32> to vector<4x256xf32>
    %c0_4 = arith.constant 0 : index
    %c0_5 = arith.constant 0 : index
    %7 = vector.load %arg3[%c0_4, %c0_5] : memref<4x1xf32, #tpu.memory_space<vmem>>, vector<4x1xf32>
    %cst = arith.constant dense<0.000000e+00> : vector<4xf32>
    %8 = vector.multi_reduction <add>, %6, %cst [1] : vector<4x256xf32> to vector<4xf32>
    %9 = vector.shape_cast %8 : vector<4xf32> to vector<4x1xf32>
    %10 = arith.addf %7, %9 : vector<4x1xf32>
    %c0_6 = arith.constant 0 : index
    %c0_7 = arith.constant 0 : index
    %11 = vector.load %arg3[%c0_6, %c0_7] : memref<4x1xf32, #tpu.memory_space<vmem>>, vector<4x1xf32>
    tpu.vector_store %arg3[%c0_6, %c0_7], %10 {strides = array<i32>} : memref<4x1xf32, #tpu.memory_space<vmem>>, vector<4x1xf32>,
    %c0_8 = arith.constant 0 : index
    %c0_9 = arith.constant 0 : index
    %12 = vector.load %arg4[%c0_8, %c0_9] : memref<4x1xf32, #tpu.memory_space<vmem>>, vector<4x1xf32>
    %13 = arith.mulf %6, %6 : vector<4x256xf32>
    %cst_10 = arith.constant dense<0.000000e+00> : vector<4xf32>
    %14 = vector.multi_reduction <add>, %13, %cst_10 [1] : vector<4x256xf32> to vector<4xf32>
    %15 = vector.shape_cast %14 : vector<4xf32> to vector<4x1xf32>
    %16 = arith.addf %12, %15 : vector<4x1xf32>
    %c0_11 = arith.constant 0 : index
    %c0_12 = arith.constant 0 : index
    %17 = vector.load %arg4[%c0_11, %c0_12] : memref<4x1xf32, #tpu.memory_space<vmem>>, vector<4x1xf32>
    tpu.vector_store %arg4[%c0_11, %c0_12], %16 {strides = array<i32>} : memref<4x1xf32, #tpu.memory_space<vmem>>, vector<4x1xf32>,
    return
  }
  func.func @transform_0(%arg0: i32, %arg1: i32) -> (i32, i32, i32) {
    %c0_i32 = arith.constant 0 : i32
    %c0_i32_0 = arith.constant 0 : i32
    return %arg0, %c0_i32, %arg1 : i32, i32, i32
  }
  func.func @transform_1(%arg0: i32, %arg1: i32) -> (i32, i32) {
    %c0_i32 = arith.constant 0 : i32
    %c0_i32_0 = arith.constant 0 : i32
    %c0_i32_1 = arith.constant 0 : i32
    return %c0_i32, %c0_i32_0 : i32, i32
  }
  func.func @transform_2(%arg0: i32, %arg1: i32) -> (i32, i32) {
    %c0_i32 = arith.constant 0 : i32
    %c0_i32_0 = arith.constant 0 : i32
    %c0_i32_1 = arith.constant 0 : i32
    return %c0_i32, %c0_i32_0 : i32, i32
  }
}

</mosaic_0001>

<bundles_post_ra>
// kernel: actnorm_init_params.1
= control target key start
LH: loop header
LB: loop body
LE: loop exit
PB: predicated region body
PF: predicated region fallthrough
CT: control target
= control target key end

     0   :  { %s320_s9 = smov 0   ;;  %s322_s10 = smov 0   ;;  %s368_s0 = inlined_call_operand.vmem [shape: f32[2,4,256], index: 0, kind: input, shape index: {}]   ;;  %s369_s1 = inlined_call_operand.vmem [shape: f32[4,1], index: 1, kind: output, shape index: {0}]   ;;  %s370_s2 = inlined_call_operand.vmem [shape: f32[4,1], index: 2, kind: output, shape index: {1}]  }
   0x1   :  { %s324_s11 = smov 0  }
   0x2 LB: > { %s25_s12 = sadd.s32 1, %s298_s10  ;;  %p247_p0 = scmp.ge.s32.totalorder %s302_s11, 1  ;;  %s302_s11 = sphi %s324_s11, %s13_s11   ;;  %s298_s10 = sphi %s322_s10, %s372_s10   ;;  %s294_s9 = sphi %s320_s9, %s371_s9  }
   0x3   : > { %p27_p1 = scmp.ge.s32.totalorder %s25_s12, 2  ;;  %p124_p2 = scmp.lt.s32.totalorder %s302_s11, 3 }
   0x5   : > { %s374_s12 = smov (%p27_p1, %s25_s12), 0  ;;  %p125_p3 = pnand %p247_p0, %p124_p2 }
   0x6   : > { %p146_p4 = scmp.lt.s32.totalorder (!%p125_p3), %s294_s9, 1  ;;  %p155_p5 = scmp.eq.s32.totalorder (!%p125_p3), %s294_s9, 0 }
   0x7   : > { %128 = sbr.rel (%p125_p3) target bundleno = 156 (0x9c), region = 24 }
   0xc   : > { %s376_s9 = smov (!%p146_p4, %s294_s9), 1  ;;  %160 = sbr.rel (!%p155_p5) target bundleno = 17 (0x11), region = 28  ;;  %vm161_vm0 = vcmask (%p155_p5), 3072   ;;  %v304_v0 = vmov (%p155_p5), 0.0  }
   0xd   : > { %s253_s13 = sshll.u32 %s376_s9, 3  ;;  %162 = vst.msk [vmem:[%s369_s1] sm:$0xf] (%p155_p5), %vm161_vm0, %v304_v0 }
   0xe   : > { %s153_s16 = scalar_lea.vmem %s368_s0, %s253_s13  ;;  %163 = vst.msk [vmem:[%s370_s2] sm:$0xf] (%p155_p5), %vm161_vm0, %v304_v0 }
  0x11 PF: > { %v164_v1 = vld [vmem:[%s153_s16] sm:$0xff]  ;;  %vm172_vm1 = vcmask 1043456   ;;  %vm179_vm2 = vcmask 3072  }
  0x12   : > { %167 = vst [vmem:[#allocation1] ss:$2 sm:$0xff] %v164_v1  ;;  %v182_v2 = vmul.f32 %v164_v1, %v164_v1 }
  0x14   : > { %v165_v13 = vld [vmem:[%s369_s1] sm:$0xf] }
  0x15   : > { %v181_v16 = vld [vmem:[%s370_s2] sm:$0xf] }
  0x19   : > { %v168_v3 = vld.sshfl [vmem:[#allocation1] sm:$0xff pattern:$0x75316420]  ;;  %v169_v4 = vld.sshfl [vmem:[#allocation1 + $0x8] sm:$0xff pattern:$0x75316420] }
  0x1a   : > { %v173_v5 = vsel %vm172_vm1, %v168_v3, 0.0  ;;  %v174_v6 = vsel %vm172_vm1, %v169_v4, 0.0  ;;  %184 = vst [vmem:[#allocation1] ss:$2 sm:$0xff] %v182_v2 }
  0x1b   : > { %v175_v7 = vadd.f32 %v174_v6, %v173_v5 }
  0x1d   : > { %176 = vadd.xlane.f32.xlu0 %v175_v7 }
  0x21   : > { %v185_v8 = vld.sshfl [vmem:[#allocation1] sm:$0xff pattern:$0x75316420]  ;;  %v186_v9 = vld.sshfl [vmem:[#allocation1 + $0x8] sm:$0xff pattern:$0x75316420] }
  0x22   : > { %v189_v10 = vsel %vm172_vm1, %v185_v8, 0.0  ;;  %v190_v11 = vsel %vm172_vm1, %v186_v9, 0.0 }
  0x23   : > { %v191_v12 = vadd.f32 %v190_v11, %v189_v10 }
  0x25   : > { %192 = vadd.xlane.f32.xlu0 %v191_v12 }
  0x90   : > { %v177_v14 = vpop.xlane.xlu0 %176 }
  0x91   : > { %v178_v15 = vadd.f32 %v177_v14, %v165_v13 }
  0x93   : > { %180 = vst.msk [vmem:[%s369_s1] sm:$0xf] %vm179_vm2, %v178_v15 }
  0x98   : > { %v193_v17 = vpop.xlane.xlu0 %192 }
  0x99   : > { %v194_v18 = vadd.f32 %v193_v17, %v181_v16 }
  0x9b   : > { %195 = vst.msk [vmem:[%s370_s2] sm:$0xf] %vm179_vm2, %v194_v18 }
  0x9c PF: > { %s13_s11 = sadd.s32 1, %s302_s11   ;;  %s371_s9 = smov %s298_s10 }
  0x9d   : > { %p10_p6 = scmp.ge.s32.totalorder %s13_s11, 4   ;;  %s372_s10 = smov %s374_s12 }
  0x9f   :  { %12 = sbr.rel (!%p10_p6) target bundleno = 2 (0x2), region = 62 }

</bundles_post_ra>
